<compile_context>
chip_gen: v7x
topology: tpu7x:2x2x1
jax: 0.10.0
libtpu: 0.0.40
codegen_flags: <defaults>
</compile_context>

<pallas_src>
import functools

import jax
import jax.numpy as jnp
from jax.experimental import pallas as pl
from jax.experimental.pallas import tpu as pltpu


def _round_up(x: int, m: int) -> int:
    return ((x + m - 1) // m) * m


def autoencoder_kernel(x_ref, wg_ref, bg_ref, wh_ref, bh_ref, o_ref):
    # Encoder: (TILE_B, Q)bf16 @ (Q, K)bf16 -> f32 accumulate, bias + sigmoid in f32.
    h = jnp.dot(x_ref[...], wg_ref[...], preferred_element_type=jnp.float32)
    h = jax.nn.sigmoid(h + bg_ref[...])

    # TODO(synk): nn.Dropout(p=0.5) is identity in eval mode; training-mode dropout
    # would use pltpu.prng_seed + pltpu.prng_random_bits to build a Bernoulli mask.

    # Decoder: cast hidden to bf16 for the MXU, accumulate in f32.
    out = jnp.dot(h.astype(wh_ref.dtype), wh_ref[...],
                  preferred_element_type=jnp.float32)
    o_ref[...] = jax.nn.sigmoid(out + bh_ref[...]).astype(o_ref.dtype)


@functools.partial(jax.jit, static_argnames=("tile_b",))
def autoencoder_forward(x, wg, bg, wh, bh, *, tile_b: int = 512):
    """x: (B, Q) f32; wg: (Q, K); bg: (1, K); wh: (K, Q); bh: (1, Q). Returns (B, Q) f32."""
    B, Q = x.shape
    K = wg.shape[1]

    # Row tile: large (for HBM-roofline pipelining) but no larger than the padded batch.
    # Multiple of 16 so bf16 input tiles / f32 output tiles satisfy TPU (sublane) tiling.
    tile_b = min(tile_b, _round_up(B, 16))
    tile_b = _round_up(tile_b, 16)
    B_pad = _round_up(B, tile_b)

    # Cast matmul inputs to bf16 (f32 accumulation inside the kernel).
    x_b = x.astype(jnp.bfloat16)
    wg_b = wg.astype(jnp.bfloat16)
    wh_b = wh.astype(jnp.bfloat16)
    bg_f = bg.astype(jnp.float32)
    bh_f = bh.astype(jnp.float32)

    if B_pad != B:
        x_b = jnp.pad(x_b, ((0, B_pad - B), (0, 0)))

    grid = (B_pad // tile_b,)

    # VMEM budget: double-buffered x tile (bf16) + out tile (f32) + resident weights,
    # with 2x headroom for compiler-managed buffers. Keeps well under v7x's 64 MiB.
    tile_bytes = tile_b * Q * 2 + tile_b * Q * 4
    weight_bytes = (Q * K + K * Q) * 2 + (K + Q) * 4
    vmem_limit = min(32 << 20, max(4 << 20, 2 * (2 * tile_bytes + weight_bytes)))

    out = pl.pallas_call(
        autoencoder_kernel,
        out_shape=jax.ShapeDtypeStruct((B_pad, Q), jnp.float32),
        grid=grid,
        in_specs=[
            pl.BlockSpec((tile_b, Q), lambda i: (i, 0)),   # x: streamed per tile
            pl.BlockSpec((Q, K), lambda i: (0, 0)),        # Wg: resident
            pl.BlockSpec((1, K), lambda i: (0, 0)),        # bg: resident
            pl.BlockSpec((K, Q), lambda i: (0, 0)),        # Wh: resident
            pl.BlockSpec((1, Q), lambda i: (0, 0)),        # bh: resident
        ],
        out_specs=pl.BlockSpec((tile_b, Q), lambda i: (i, 0)),
        compiler_params=pltpu.CompilerParams(
            dimension_semantics=("parallel",),
            vmem_limit_bytes=vmem_limit,
        ),
    )(x_b, wg_b, bg_f, wh_b, bh_f)

    if B_pad != B:
        out = out[:B]
    return out


if __name__ == "__main__":
    # Small shapes consistent with the module: num_question=256, k=128, batch=8.
    B, Q, K = 8, 256, 128

    key = jax.random.PRNGKey(0)
    kx, kwg, kbg, kwh, kbh = jax.random.split(key, 5)

    # nn.Linear-style init, weights stored pre-transposed as (in_features, out_features).
    bound_g = 1.0 / jnp.sqrt(jnp.float32(Q))
    bound_h = 1.0 / jnp.sqrt(jnp.float32(K))
    wg = jax.random.uniform(kwg, (Q, K), jnp.float32, -bound_g, bound_g)
    bg = jax.random.uniform(kbg, (1, K), jnp.float32, -bound_g, bound_g)
    wh = jax.random.uniform(kwh, (K, Q), jnp.float32, -bound_h, bound_h)
    bh = jax.random.uniform(kbh, (1, Q), jnp.float32, -bound_h, bound_h)

    x = jax.random.uniform(kx, (B, Q), jnp.float32)  # student-response matrix rows

    out = autoencoder_forward(x, wg, bg, wh, bh)
    out = jax.block_until_ready(out)

    # Pure-JAX f32 reference; bf16 matmul inputs => relaxed tolerance.
    ref = jax.nn.sigmoid(jax.nn.sigmoid(x @ wg + bg) @ wh + bh)
    assert out.shape == (B, Q), out.shape
    assert jnp.allclose(out, ref, atol=2e-2, rtol=2e-2), float(jnp.max(jnp.abs(out - ref)))

    print("KERNEL_OK")
</pallas_src>

<mosaic_0001>
module attributes {stable_mosaic.version = 11 : i64} {
  func.func @autoencoder_kernel(%arg0: i32, %arg1: memref<16x256xbf16, #tpu.memory_space<vmem>>, %arg2: memref<256x128xbf16, #tpu.memory_space<vmem>>, %arg3: memref<1x128xf32, #tpu.memory_space<vmem>>, %arg4: memref<128x256xbf16, #tpu.memory_space<vmem>>, %arg5: memref<1x256xf32, #tpu.memory_space<vmem>>, %arg6: memref<16x256xf32, #tpu.memory_space<vmem>>) attributes {dimension_semantics = [#tpu.dimension_semantics<parallel>], iteration_bounds = array<i64: 1>, scalar_prefetch = 0 : i64, scratch_operands = 0 : i64, tpu.core_type = #tpu.core_type<tc>, window_params = [{transform_indices = @transform_0, window_bounds = array<i64: 16, 256>}, {pipeline_mode = #tpu.pipeline_mode<synchronous>, transform_indices = @transform_1, window_bounds = array<i64: 256, 128>}, {pipeline_mode = #tpu.pipeline_mode<synchronous>, transform_indices = @transform_2, window_bounds = array<i64: 1, 128>}, {pipeline_mode = #tpu.pipeline_mode<synchronous>, transform_indices = @transform_3, window_bounds = array<i64: 128, 256>}, {pipeline_mode = #tpu.pipeline_mode<synchronous>, transform_indices = @transform_4, window_bounds = array<i64: 1, 256>}, {transform_indices = @transform_5, window_bounds = array<i64: 16, 256>}]} {
    %c0 = arith.constant 0 : index
    %c0_0 = arith.constant 0 : index
    %0 = vector.load %arg1[%c0, %c0_0] : memref<16x256xbf16, #tpu.memory_space<vmem>>, vector<16x256xbf16>
    %c0_1 = arith.constant 0 : index
    %c0_2 = arith.constant 0 : index
    %1 = vector.load %arg2[%c0_1, %c0_2] : memref<256x128xbf16, #tpu.memory_space<vmem>>, vector<256x128xbf16>
    %cst = arith.constant dense<0.000000e+00> : vector<16x128xf32>
    %2 = tpu.matmul %0, %1, %cst {dimension_numbers = #tpu.dot_dimension_numbers<[1], [0], [0], [1], [0, 0, 1, 1], [], []>} : vector<16x256xbf16>, vector<256x128xbf16>, vector<16x128xf32> -> vector<16x128xf32>
    %c0_3 = arith.constant 0 : index
    %c0_4 = arith.constant 0 : index
    %3 = vector.load %arg3[%c0_3, %c0_4] : memref<1x128xf32, #tpu.memory_space<vmem>>, vector<1x128xf32>
    %4 = vector.broadcast %3 : vector<1x128xf32> to vector<16x128xf32>
    %5 = arith.addf %2, %4 : vector<16x128xf32>
    %6 = arith.negf %5 : vector<16x128xf32>
    %7 = math.exp %6 : vector<16x128xf32>
    %cst_5 = arith.constant 1.000000e+00 : f32
    %8 = vector.broadcast %cst_5 : f32 to vector<16x128xf32>
    %9 = arith.addf %8, %7 : vector<16x128xf32>
    %10 = arith.divf %8, %9 : vector<16x128xf32>
    %11 = arith.truncf %10 : vector<16x128xf32> to vector<16x128xbf16>
    %c0_6 = arith.constant 0 : index
    %c0_7 = arith.constant 0 : index
    %12 = vector.load %arg4[%c0_6, %c0_7] : memref<128x256xbf16, #tpu.memory_space<vmem>>, vector<128x256xbf16>
    %cst_8 = arith.constant dense<0.000000e+00> : vector<16x256xf32>
    %13 = tpu.matmul %11, %12, %cst_8 {dimension_numbers = #tpu.dot_dimension_numbers<[1], [0], [0], [1], [0, 0, 1, 1], [], []>} : vector<16x128xbf16>, vector<128x256xbf16>, vector<16x256xf32> -> vector<16x256xf32>
    %c0_9 = arith.constant 0 : index
    %c0_10 = arith.constant 0 : index
    %14 = vector.load %arg5[%c0_9, %c0_10] : memref<1x256xf32, #tpu.memory_space<vmem>>, vector<1x256xf32>
    %15 = vector.broadcast %14 : vector<1x256xf32> to vector<16x256xf32>
    %16 = arith.addf %13, %15 : vector<16x256xf32>
    %17 = arith.negf %16 : vector<16x256xf32>
    %18 = math.exp %17 : vector<16x256xf32>
    %cst_11 = arith.constant 1.000000e+00 : f32
    %19 = vector.broadcast %cst_11 : f32 to vector<16x256xf32>
    %20 = arith.addf %19, %18 : vector<16x256xf32>
    %21 = arith.divf %19, %20 : vector<16x256xf32>
    %c0_12 = arith.constant 0 : index
    %c0_13 = arith.constant 0 : index
    %22 = vector.load %arg6[%c0_12, %c0_13] : memref<16x256xf32, #tpu.memory_space<vmem>>, vector<16x256xf32>
    tpu.vector_store %arg6[%c0_12, %c0_13], %21 {strides = array<i32>} : memref<16x256xf32, #tpu.memory_space<vmem>>, vector<16x256xf32>,
    return
  }
  func.func @transform_0(%arg0: i32) -> (i32, i32) {
    %c0_i32 = arith.constant 0 : i32
    %c0_i32_0 = arith.constant 0 : i32
    return %arg0, %c0_i32 : i32, i32
  }
  func.func @transform_1(%arg0: i32) -> (i32, i32) {
    %c0_i32 = arith.constant 0 : i32
    %c0_i32_0 = arith.constant 0 : i32
    %c0_i32_1 = arith.constant 0 : i32
    return %c0_i32, %c0_i32_0 : i32, i32
  }
  func.func @transform_2(%arg0: i32) -> (i32, i32) {
    %c0_i32 = arith.constant 0 : i32
    %c0_i32_0 = arith.constant 0 : i32
    %c0_i32_1 = arith.constant 0 : i32
    return %c0_i32, %c0_i32_0 : i32, i32
  }
  func.func @transform_3(%arg0: i32) -> (i32, i32) {
    %c0_i32 = arith.constant 0 : i32
    %c0_i32_0 = arith.constant 0 : i32
    %c0_i32_1 = arith.constant 0 : i32
    return %c0_i32, %c0_i32_0 : i32, i32
  }
  func.func @transform_4(%arg0: i32) -> (i32, i32) {
    %c0_i32 = arith.constant 0 : i32
    %c0_i32_0 = arith.constant 0 : i32
    %c0_i32_1 = arith.constant 0 : i32
    return %c0_i32, %c0_i32_0 : i32, i32
  }
  func.func @transform_5(%arg0: i32) -> (i32, i32) {
    %c0_i32 = arith.constant 0 : i32
    %c0_i32_0 = arith.constant 0 : i32
    return %arg0, %c0_i32 : i32, i32
  }
}

</mosaic_0001>

<bundles_post_ra>
// kernel: autoencoder_forward.1
= control target key start
LH: loop header
LB: loop body
LE: loop exit
PB: predicated region body
PF: predicated region fallthrough
CT: control target
= control target key end

     0   :  { %v536_v32 = vmov 0   ;;  %v240_v53 = vlaneseq  ;;  %s687_s1 = inlined_call_operand.vmem [shape: bf16[256,128], index: 1, kind: input, shape index: {}]   ;;  %s688_s0 = inlined_call_operand.vmem [shape: bf16[16,256], index: 0, kind: input, shape index: {}]   ;;  %s689_s3 = inlined_call_operand.vmem [shape: bf16[128,256], index: 3, kind: input, shape index: {}]   ;;  %s690_s2 = inlined_call_operand.vmem [shape: f32[1,128], index: 2, kind: input, shape index: {}]   ;;  %s691_s4 = inlined_call_operand.vmem [shape: f32[1,256], index: 4, kind: input, shape index: {}]   ;;  %s692_s5 = inlined_call_operand.vmem [shape: f32[16,256], index: 5, kind: output, shape index: {}]  }
   0x1   :  { %v469_v0 = vld [vmem:[%s687_s1 + $0x40] sm:$0xff]   ;;  %v471_v2 = vld [vmem:[%s687_s1 + $0x48] sm:$0xff]   ;;  %v473_v4 = vld [vmem:[%s687_s1 + $0x50] sm:$0xff]   ;;  %362 = vmatprep.mubr.bf16.mxu1 %v536_v32 }
   0x2   :  { %v470_v1 = vld [vmem:[%s687_s1] sm:$0xff]   ;;  %446 = vmatprep.subr.bf16.mxu0 %v469_v0  ;;  %v472_v3 = vld [vmem:[%s687_s1 + $0x8] sm:$0xff]   ;;  %v474_v5 = vld [vmem:[%s687_s1 + $0x10] sm:$0xff]   ;;  %v241_v54 = vshrl.u32 %v240_v53, 7 }
   0x3   :  { %447 = vmatpush3.bf16.msra.mxu0 %v470_v1  ;;  %v475_v6 = vld [vmem:[%s687_s1 + $0x58] sm:$0xff]   ;;  %v477_v8 = vld [vmem:[%s687_s1 + $0x60] sm:$0xff]   ;;  %v479_v10 = vld [vmem:[%s687_s1 + $0x68] sm:$0xff]  }
   0x4   :  { %448 = vmatprep.subr.bf16.mxu0 %v471_v2  ;;  %v476_v7 = vld [vmem:[%s687_s1 + $0x18] sm:$0xff]   ;;  %v478_v9 = vld [vmem:[%s687_s1 + $0x20] sm:$0xff]   ;;  %v480_v12 = vld [vmem:[%s687_s1 + $0x28] sm:$0xff]   ;;  %v242_v55 = vsub.s32 0, %v241_v54  ;;  %v246_v57 = vsub.s32 1, %v241_v54 }
   0x5   :  { %v487_v11 = vld [vmem:[%s688_s0 + $0x4] ss:$8 sps:$4 sm:$0xff]   ;;  %v481_v13 = vld [vmem:[%s687_s1 + $0x70] sm:$0xff]   ;;  %v483_v15 = vld [vmem:[%s687_s1 + $0x78] sm:$0xff]  }
   0x6   :  { %200 = vmatprep.mubr.bf16.mxu0 %v487_v11  ;;  %v482_v14 = vld [vmem:[%s687_s1 + $0x30] sm:$0xff]   ;;  %v484_v16 = vld [vmem:[%s687_s1 + $0x38] sm:$0xff]   ;;  %v485_v17 = vld [vmem:[%s688_s0] ss:$8 sps:$4 sm:$0xff]  }
   0x7   :  { %449 = vmatpush3.bf16.msra.mxu0 %v472_v3  ;;  %v488_v18 = vld [vmem:[%s689_s3 + $0x4] ss:$8 sps:$4 sm:$0xff]   ;;  %v490_v19 = vld [vmem:[%s689_s3] ss:$8 sps:$4 sm:$0xff]   ;;  %v491_v20 = vld [vmem:[%s689_s3 + $0x14] ss:$8 sps:$4 sm:$0xff]  }
   0x8   :  { %450 = vmatprep.subr.bf16.mxu0 %v473_v4  ;;  %330 = vmatprep.subr.bf16.mxu1 %v488_v18  ;;  %v493_v21 = vld [vmem:[%s689_s3 + $0x10] ss:$8 sps:$4 sm:$0xff]   ;;  %v494_v22 = vld [vmem:[%s689_s3 + $0x24] ss:$8 sps:$4 sm:$0xff]   ;;  %v496_v23 = vld [vmem:[%s689_s3 + $0x20] ss:$8 sps:$4 sm:$0xff]  }
   0x9   :  { %331 = vmatpush1.bf16.msra.mxu1 %v490_v19  ;;  %v497_v24 = vld [vmem:[%s689_s3 + $0x34] ss:$8 sps:$4 sm:$0xff]   ;;  %v499_v25 = vld [vmem:[%s689_s3 + $0x30] ss:$8 sps:$4 sm:$0xff]   ;;  %v500_v26 = vld [vmem:[%s689_s3 + $0x44] ss:$8 sps:$4 sm:$0xff]  }
   0xa   :  { %332 = vmatprep.subr.bf16.mxu1 %v491_v20  ;;  %v502_v27 = vld [vmem:[%s689_s3 + $0x40] ss:$8 sps:$4 sm:$0xff]   ;;  %v503_v28 = vld [vmem:[%s689_s3 + $0x54] ss:$8 sps:$4 sm:$0xff]   ;;  %v505_v29 = vld [vmem:[%s689_s3 + $0x50] ss:$8 sps:$4 sm:$0xff]  }
   0xb   :  { %451 = vmatpush3.bf16.msra.mxu0 %v474_v5  ;;  %v506_v30 = vld [vmem:[%s689_s3 + $0x64] ss:$8 sps:$4 sm:$0xff]   ;;  %v508_v31 = vld [vmem:[%s689_s3 + $0x60] ss:$8 sps:$4 sm:$0xff]   ;;  %v509_v33 = vld [vmem:[%s689_s3 + $0x74] ss:$8 sps:$4 sm:$0xff]  }
   0xc   :  { %452 = vmatprep.subr.bf16.mxu0 %v475_v6  ;;  %v511_v34 = vld [vmem:[%s689_s3 + $0x70] ss:$8 sps:$4 sm:$0xff]   ;;  %v405_v36 = vld [vmem:[%s690_s2] ss:$0 sm:$0xff] }
   0xd   :  { %333 = vmatpush1.bf16.msra.mxu1 %v493_v21  ;;  %v238_v56 = vld [vmem:[%s691_s4] sm:$0x3] }
   0xe   :  { %334 = vmatprep.subr.bf16.mxu1 %v494_v22  ;;  %v243_v58 = vrot.slane %v238_v56, %v242_v55  ;;  %v247_v59 = vrot.slane %v238_v56, %v246_v57 }
   0xf   :  { %453 = vmatpush3.bf16.msra.mxu0 %v476_v7 }
  0x10   :  { %454 = vmatprep.subr.bf16.mxu0 %v477_v8 }
  0x11   :  { %335 = vmatpush1.bf16.msra.mxu1 %v496_v23 }
  0x12   :  { %336 = vmatprep.subr.bf16.mxu1 %v497_v24 }
  0x13   :  { %455 = vmatpush3.bf16.msra.mxu0 %v478_v9 }
  0x14   :  { %456 = vmatprep.subr.bf16.mxu0 %v479_v10 }
  0x15   :  { %337 = vmatpush1.bf16.msra.mxu1 %v499_v25 }
  0x16   :  { %338 = vmatprep.subr.bf16.mxu1 %v500_v26 }
  0x17   :  { %457 = vmatpush3.bf16.msra.mxu0 %v480_v12 }
  0x18   :  { %458 = vmatprep.subr.bf16.mxu0 %v481_v13 }
  0x19   :  { %339 = vmatpush1.bf16.msra.mxu1 %v502_v27 }
  0x1a   :  { %340 = vmatprep.subr.bf16.mxu1 %v503_v28 }
  0x1b   :  { %459 = vmatpush3.bf16.msra.mxu0 %v482_v14 }
  0x1c   :  { %460 = vmatprep.subr.bf16.mxu0 %v483_v15 }
  0x1d   :  { %341 = vmatpush1.bf16.msra.mxu1 %v505_v29 }
  0x1e   :  { %342 = vmatprep.subr.bf16.mxu1 %v506_v30 }
  0x1f   :  { %461 = vmatpush3.bf16.msra.mxu0 %v484_v16 }
  0x21   :  { %343 = vmatpush1.bf16.msra.mxu1 %v508_v31 }
  0x22   :  { %201 = vmatmul.mubr.bf16.vlgmr.msra.gmra.mrb[0].mxu0 %v485_v17  ;;  %344 = vmatprep.subr.bf16.mxu1 %v509_v33 }
  0x25   :  { %345 = vmatpush1.bf16.msra.mxu1 %v511_v34 }
  0xf5   :  { %v462_v35 = vpop.f32.mrb[0].mxu0 }
  0xf6   :  { %v463_v37 = vpop.f32.mrb[1].mxu0 }
  0xf7   :  { %v464_v38 = vadd.f32 %v463_v37, %v462_v35  ;;  %v465_v39 = vpop.f32.mrb[2].mxu0 }
  0xf8   :  { %v466_v40 = vpop.f32.mrb[3].mxu0 }
  0xf9   :  { %v203_v41 = vadd.f32 %v464_v38, %v405_v36  ;;  %v467_v42 = vadd.f32 %v466_v40, %v465_v39 }
  0xfb   :  { %v424_v43 = vmul.f32 -1.442695, %v203_v41  ;;  %v206_v44 = vadd.f32 %v467_v42, %v405_v36 }
  0xfd   :  { %512 = vpow2.f32 %v424_v43  ;;  %v425_v45 = vmul.f32 -1.442695, %v206_v44 }
  0xff   :  { %514 = vpow2.f32 %v425_v45 }
 0x107   :  { %v513_v46 = vpop.eup %512 }
 0x108   :  { %v215_v47 = vadd.f32 1.0, %v513_v46 }
 0x109   :  { %v515_v48 = vpop.eup %514 }
 0x10a   :  { %v216_v49 = vadd.f32 1.0, %v515_v48  ;;  %516 = vrcp.f32 %v215_v47 }
 0x10c   :  { %518 = vrcp.f32 %v216_v49 }
 0x114   :  { %v517_v50 = vpop.eup %516 }
 0x116   :  { %v519_v51 = vpop.eup %518 }
 0x117   :  { %v221_v52 = vpack.c.bf16 %v519_v51, %v517_v50 }
 0x119   :  { %363 = vmatmul.mubr.bf16.vlgmr.msra.gmra.mrb[0].mxu1 %v221_v52 }
 0x1ec   :  { %v364_v60 = vpop.f32.mrb[0].mxu1 }
 0x1ed   :  { %v365_v61 = vadd.f32 %v364_v60, %v243_v58  ;;  %v366_v62 = vpop.f32.mrb[1].mxu1 }
 0x1ee   :  { %v367_v63 = vadd.f32 %v366_v62, %v247_v59  ;;  %v368_v0 = vpop.f32.mrb[2].mxu1 }
 0x1ef   :  { %v442_v1 = vmul.f32 -1.442695, %v365_v61  ;;  %v369_v2 = vadd.f32 %v368_v0, %v243_v58  ;;  %v370_v3 = vpop.f32.mrb[3].mxu1 }
 0x1f0   :  { %v443_v4 = vmul.f32 -1.442695, %v367_v63  ;;  %v371_v5 = vadd.f32 %v370_v3, %v247_v59 }
 0x1f1   :  { %520 = vpow2.f32 %v442_v1  ;;  %v444_v6 = vmul.f32 -1.442695, %v369_v2 }
 0x1f2   :  { %522 = vpow2.f32 %v443_v4  ;;  %v445_v7 = vmul.f32 -1.442695, %v371_v5 }
 0x1f3   :  { %524 = vpow2.f32 %v444_v6 }
 0x1f4   :  { %526 = vpow2.f32 %v445_v7 }
 0x1fb   :  { %v521_v8 = vpop.eup %520 }
 0x1fc   :  { %v523_v9 = vpop.eup %522  ;;  %v385_v10 = vadd.f32 1.0, %v521_v8 }
 0x1fd   :  { %v525_v11 = vpop.eup %524  ;;  %v386_v12 = vadd.f32 1.0, %v523_v9 }
 0x1fe   :  { %v527_v13 = vpop.eup %526  ;;  %528 = vrcp.f32 %v385_v10  ;;  %v387_v14 = vadd.f32 1.0, %v525_v11 }
 0x1ff   :  { %530 = vrcp.f32 %v386_v12  ;;  %v388_v15 = vadd.f32 1.0, %v527_v13 }
 0x200   :  { %532 = vrcp.f32 %v387_v14 }
 0x201   :  { %534 = vrcp.f32 %v388_v15 }
 0x208   :  { %v529_v16 = vpop.eup %528 }
 0x209   :  { %v531_v17 = vpop.eup %530  ;;  %397 = vst [vmem:[%s692_s5] sm:$0xff] %v529_v16 }
 0x20a   :  { %v533_v18 = vpop.eup %532  ;;  %398 = vst [vmem:[%s692_s5 + $0x8] sm:$0xff] %v531_v17 }
 0x20b   :  { %v535_v19 = vpop.eup %534  ;;  %399 = vst [vmem:[%s692_s5 + $0x10] sm:$0xff] %v533_v18 }
 0x20c   :  { %400 = vst [vmem:[%s692_s5 + $0x18] sm:$0xff] %v535_v19 }

</bundles_post_ra>
